<compile_context>
chip_gen: v7x
topology: tpu7x:2x2x1
jax: 0.10.0
libtpu: 0.0.40
codegen_flags: <defaults>
</compile_context>

<pallas_src>
import functools

import jax
import jax.numpy as jnp
from jax import lax
from jax.experimental import pallas as pl
from jax.experimental.pallas import tpu as pltpu


def _round_up(n: int, m: int) -> int:
    return ((n + m - 1) // m) * m


def _fused_mlp_kernel(*refs, n_linear: int, precision):
    """Chain of Linear(+ReLU) layers, fully resident in VMEM.

    refs = (x_ref, w_0..w_{L-1}, b_0..b_{L-1}, o_ref)
      x_ref : [Bt, F_in_pad]         (compute dtype)
      w_l   : [Fin_l_pad, Fout_l_pad] (compute dtype)
      b_l   : [1, Fout_l_pad]         (f32)
      o_ref : [Bt, F_out_pad]         (f32)
    """
    x_ref = refs[0]
    w_refs = refs[1:1 + n_linear]
    b_refs = refs[1 + n_linear:1 + 2 * n_linear]
    o_ref = refs[1 + 2 * n_linear]

    h = x_ref[...]
    for l in range(n_linear):                          # static unroll (L is tiny)
        w = w_refs[l][...]
        acc = jnp.dot(h.astype(w.dtype), w,            # MXU, f32 accumulate
                      preferred_element_type=jnp.float32,
                      precision=precision)
        acc = acc + b_refs[l][...]                     # [1, Fout] broadcast (VPU)
        if l < n_linear - 1:
            acc = jnp.maximum(acc, 0.0)                # fused ReLU
        h = acc
    o_ref[...] = h.astype(o_ref.dtype)


def prepare_params(params, *, compute_dtype=jnp.float32):
    """One-time packing of (W, b) into lane-dense, per-layer-padded slabs.

    params: list of (W [in, out], b [out]) — W is the transpose of torch's [out, in].
    Zero padding is exact: zero weight rows kill padded input lanes, zero weight
    columns + zero bias keep padded output lanes exactly zero through ReLU.
    """
    ws, bs = [], []
    for w, b in params:
        fi, fo = w.shape
        fi_p, fo_p = _round_up(fi, 128), _round_up(fo, 128)
        wp = jnp.zeros((fi_p, fo_p), compute_dtype).at[:fi, :fo].set(
            w.astype(compute_dtype))
        bp = jnp.zeros((1, fo_p), jnp.float32).at[0, :fo].set(
            b.astype(jnp.float32))
        ws.append(wp)
        bs.append(bp)
    meta = dict(obs_dim=params[0][0].shape[0],
                action_dim=params[-1][0].shape[1],
                compute_dtype=jnp.dtype(compute_dtype))
    return tuple(ws), tuple(bs), meta


def mlp_policy_forward(x, prepared, *, batch_tile: int = 512):
    """Fused MLPPolicy.forward.

    x: [B, obs_dim] float32
    prepared: result of prepare_params(params, ...)
    Returns [B, action_dim] float32.
    """
    ws, bs, meta = prepared
    n_linear = len(ws)
    B, obs_dim = x.shape
    assert obs_dim == meta["obs_dim"]
    action_dim = meta["action_dim"]
    compute_dtype = meta["compute_dtype"]
    f32_mode = compute_dtype == jnp.dtype(jnp.float32)

    F_in = ws[0].shape[0]
    F_out = ws[-1].shape[1]

    # Pad only the feature axis (cheap widen); batch is left ragged.
    x_c = x.astype(compute_dtype)
    if F_in != obs_dim:
        x_c = jnp.pad(x_c, ((0, 0), (0, F_in - obs_dim)))

    # fp32 operands use HIGHEST for torch parity; bf16 operands (rollout
    # throughput mode on v6e/v7x) use the native single-pass MXU path.
    precision = lax.Precision.HIGHEST if f32_mode else lax.Precision.DEFAULT
    kernel = functools.partial(_fused_mlp_kernel,
                               n_linear=n_linear, precision=precision)

    itemsize = jnp.dtype(compute_dtype).itemsize
    w_bytes = sum(int(w.size) * itemsize for w in ws)
    b_bytes = sum(int(b.size) * 4 for b in bs)

    batch_tile = max(8, _round_up(int(batch_tile), 8))   # (8,128) guard
    use_grid = B > batch_tile

    if not use_grid:
        # Small batch (the common get_action path): single gridless call, no
        # software-pipeline bookkeeping, everything lives in VMEM.
        blk_bytes = B * F_in * itemsize + B * F_out * 4 + w_bytes + b_bytes
        vmem_limit = min(64 << 20, max(2 * blk_bytes + (4 << 20), 32 << 20))
        out = pl.pallas_call(
            kernel,
            out_shape=jax.ShapeDtypeStruct((B, F_out), jnp.float32),
            in_specs=[pl.BlockSpec(memory_space=pltpu.MemorySpace.VMEM)]
            * (1 + 2 * n_linear),
            out_specs=pl.BlockSpec(memory_space=pltpu.MemorySpace.VMEM),
            compiler_params=pltpu.CompilerParams(
                vmem_limit_bytes=int(vmem_limit)),
        )(x_c, *ws, *bs)
    else:
        # Rollout / large-batch path: tile over the batch, weights + biases stay
        # resident (constant index maps), batch axis "parallel" so it shards
        # across TensorCores on multi-TC chips. Shrink the tile so there are at
        # least 2 roughly-balanced tiles (v7x megacore load balance).
        tile = min(batch_tile, _round_up((B + 1) // 2, 8))
        grid = (pl.cdiv(B, tile),)   # ragged last tile: OOB writes are masked

        in_specs = [pl.BlockSpec((tile, F_in), lambda i: (i, 0))]
        for w in ws:
            fi_p, fo_p = w.shape
            in_specs.append(pl.BlockSpec((fi_p, fo_p), lambda i: (0, 0)))
        for b in bs:
            fo_p = b.shape[1]
            in_specs.append(pl.BlockSpec((1, fo_p), lambda i: (0, 0)))
        # TODO(synk): for realistic hidden sizes on v7x (64 MiB VMEM), mark the
        # constant-index weight/bias specs with pipeline_mode=pl.Buffered(1) to
        # single-buffer them; left out here (irrelevant at these sizes).

        blk_bytes = (2 * tile * F_in * itemsize + 2 * tile * F_out * 4
                     + 2 * (w_bytes + b_bytes))
        vmem_limit = min(64 << 20, max(blk_bytes + (4 << 20), 32 << 20))

        out = pl.pallas_call(
            kernel,
            out_shape=jax.ShapeDtypeStruct((B, F_out), jnp.float32),
            grid=grid,
            in_specs=in_specs,
            out_specs=pl.BlockSpec((tile, F_out), lambda i: (i, 0)),
            compiler_params=pltpu.CompilerParams(
                dimension_semantics=("parallel",),
                vmem_limit_bytes=int(vmem_limit)),
        )(x_c, *ws, *bs)

    return out[:, :action_dim]


def init_mlp_params(key, obs_dim, hidden_size, action_dim, n_layers):
    """Mirror the nn.Linear stack: obs -> hidden -> ... -> hidden -> action.

    Returns a list of (W, b) with W in [in, out] layout (transpose of torch's).
    """
    dims = [obs_dim] + [hidden_size] * n_layers + [action_dim]
    params = []
    for i in range(len(dims) - 1):
        fan_in, fan_out = dims[i], dims[i + 1]
        key, kw, kb = jax.random.split(key, 3)
        bound = 1.0 / jnp.sqrt(jnp.float32(fan_in))  # torch Linear default init
        w = jax.random.uniform(kw, (fan_in, fan_out), jnp.float32, -bound, bound)
        b = jax.random.uniform(kb, (fan_out,), jnp.float32, -bound, bound)
        params.append((w, b))
    return params


def _reference_forward(x, params):
    """Pure-JAX reference of MLPPolicy.forward (fp32, HIGHEST precision)."""
    n = len(params)
    h = x
    for i, (w, b) in enumerate(params):
        h = jnp.dot(h, w, precision=lax.Precision.HIGHEST) + b
        if i < n - 1:
            h = jnp.maximum(h, 0.0)
    return h


if __name__ == "__main__":
    # Shapes consistent with MLPPolicy(action_dim=8, obs_dim=16, n_layers=2,
    # hidden_size=32, ...).
    obs_dim = 16
    hidden_size = 32
    action_dim = 8
    n_layers = 2

    key = jax.random.PRNGKey(0)
    key, kx, kx2 = jax.random.split(key, 3)
    params = init_mlp_params(key, obs_dim, hidden_size, action_dim, n_layers)

    # One-time parameter packing (hoisted out of the per-call path).
    prepared_f32 = prepare_params(params)                               # parity
    prepared_bf16 = prepare_params(params, compute_dtype=jnp.bfloat16)  # rollout

    # --- Small-batch (gridless) path: the get_action case, fp32 parity. ---
    batch = 4
    x = jax.random.normal(kx, (batch, obs_dim), dtype=jnp.float32)
    out = jax.block_until_ready(mlp_policy_forward(x, prepared_f32))
    ref = _reference_forward(x, params)
    assert out.shape == (batch, action_dim)
    assert jnp.allclose(out, ref, atol=1e-5, rtol=1e-5)

    # --- Batched rollout path (fp32): ragged batch-tiled "parallel" grid. ---
    big_batch = 300  # deliberately not tile-aligned to exercise the ragged tile
    x_big = jax.random.normal(kx2, (big_batch, obs_dim), dtype=jnp.float32)
    out_big = jax.block_until_ready(
        mlp_policy_forward(x_big, prepared_f32, batch_tile=128))
    ref_big = _reference_forward(x_big, params)
    assert out_big.shape == (big_batch, action_dim)
    assert jnp.allclose(out_big, ref_big, atol=1e-5, rtol=1e-5)

    # --- Batched rollout path (bf16 operands, f32 accumulate): throughput mode. ---
    out_bf16 = jax.block_until_ready(
        mlp_policy_forward(x_big, prepared_bf16, batch_tile=128))
    assert out_bf16.shape == (big_batch, action_dim)
    assert jnp.allclose(out_bf16, ref_big, atol=5e-2, rtol=5e-2)

    print("KERNEL_OK")
</pallas_src>

<mosaic_0001>
module attributes {stable_mosaic.version = 11 : i64} {
  func.func @_fused_mlp_kernel(%arg0: memref<4x128xf32, #tpu.memory_space<vmem>>, %arg1: memref<128x128xf32, #tpu.memory_space<vmem>>, %arg2: memref<128x128xf32, #tpu.memory_space<vmem>>, %arg3: memref<128x128xf32, #tpu.memory_space<vmem>>, %arg4: memref<1x128xf32, #tpu.memory_space<vmem>>, %arg5: memref<1x128xf32, #tpu.memory_space<vmem>>, %arg6: memref<1x128xf32, #tpu.memory_space<vmem>>, %arg7: memref<4x128xf32, #tpu.memory_space<vmem>>) attributes {dimension_semantics = [], scalar_prefetch = 0 : i64, scratch_operands = 0 : i64, tpu.core_type = #tpu.core_type<tc>} {
    %c0 = arith.constant 0 : index
    %c0_0 = arith.constant 0 : index
    %0 = vector.load %arg0[%c0, %c0_0] : memref<4x128xf32, #tpu.memory_space<vmem>>, vector<4x128xf32>
    %c0_1 = arith.constant 0 : index
    %c0_2 = arith.constant 0 : index
    %1 = vector.load %arg1[%c0_1, %c0_2] : memref<128x128xf32, #tpu.memory_space<vmem>>, vector<128x128xf32>
    %cst = arith.constant dense<0.000000e+00> : vector<4x128xf32>
    %2 = tpu.matmul %0, %1, %cst {dimension_numbers = #tpu.dot_dimension_numbers<[1], [0], [0], [1], [0, 0, 1, 1], [], []>, precision = #tpu.contract_precision<fp32>} : vector<4x128xf32>, vector<128x128xf32>, vector<4x128xf32> -> vector<4x128xf32>
    %c0_3 = arith.constant 0 : index
    %c0_4 = arith.constant 0 : index
    %3 = vector.load %arg4[%c0_3, %c0_4] : memref<1x128xf32, #tpu.memory_space<vmem>>, vector<1x128xf32>
    %4 = vector.broadcast %3 : vector<1x128xf32> to vector<4x128xf32>
    %5 = arith.addf %2, %4 : vector<4x128xf32>
    %cst_5 = arith.constant 0.000000e+00 : f32
    %6 = vector.broadcast %cst_5 : f32 to vector<4x128xf32>
    %7 = arith.maximumf %5, %6 : vector<4x128xf32>
    %c0_6 = arith.constant 0 : index
    %c0_7 = arith.constant 0 : index
    %8 = vector.load %arg2[%c0_6, %c0_7] : memref<128x128xf32, #tpu.memory_space<vmem>>, vector<128x128xf32>
    %cst_8 = arith.constant dense<0.000000e+00> : vector<4x128xf32>
    %9 = tpu.matmul %7, %8, %cst_8 {dimension_numbers = #tpu.dot_dimension_numbers<[1], [0], [0], [1], [0, 0, 1, 1], [], []>, precision = #tpu.contract_precision<fp32>} : vector<4x128xf32>, vector<128x128xf32>, vector<4x128xf32> -> vector<4x128xf32>
    %c0_9 = arith.constant 0 : index
    %c0_10 = arith.constant 0 : index
    %10 = vector.load %arg5[%c0_9, %c0_10] : memref<1x128xf32, #tpu.memory_space<vmem>>, vector<1x128xf32>
    %11 = vector.broadcast %10 : vector<1x128xf32> to vector<4x128xf32>
    %12 = arith.addf %9, %11 : vector<4x128xf32>
    %cst_11 = arith.constant 0.000000e+00 : f32
    %13 = vector.broadcast %cst_11 : f32 to vector<4x128xf32>
    %14 = arith.maximumf %12, %13 : vector<4x128xf32>
    %c0_12 = arith.constant 0 : index
    %c0_13 = arith.constant 0 : index
    %15 = vector.load %arg3[%c0_12, %c0_13] : memref<128x128xf32, #tpu.memory_space<vmem>>, vector<128x128xf32>
    %cst_14 = arith.constant dense<0.000000e+00> : vector<4x128xf32>
    %16 = tpu.matmul %14, %15, %cst_14 {dimension_numbers = #tpu.dot_dimension_numbers<[1], [0], [0], [1], [0, 0, 1, 1], [], []>, precision = #tpu.contract_precision<fp32>} : vector<4x128xf32>, vector<128x128xf32>, vector<4x128xf32> -> vector<4x128xf32>
    %c0_15 = arith.constant 0 : index
    %c0_16 = arith.constant 0 : index
    %17 = vector.load %arg6[%c0_15, %c0_16] : memref<1x128xf32, #tpu.memory_space<vmem>>, vector<1x128xf32>
    %18 = vector.broadcast %17 : vector<1x128xf32> to vector<4x128xf32>
    %19 = arith.addf %16, %18 : vector<4x128xf32>
    %c0_17 = arith.constant 0 : index
    %c0_18 = arith.constant 0 : index
    %20 = vector.load %arg7[%c0_17, %c0_18] : memref<4x128xf32, #tpu.memory_space<vmem>>, vector<4x128xf32>
    tpu.vector_store %arg7[%c0_17, %c0_18], %19 {strides = array<i32>} : memref<4x128xf32, #tpu.memory_space<vmem>>, vector<4x128xf32>,
    return
  }
}

</mosaic_0001>

<bundles_post_ra>
// kernel: tpu_custom_call.1
= control target key start
LH: loop header
LB: loop body
LE: loop exit
PB: predicated region body
PF: predicated region fallthrough
CT: control target
= control target key end

     0   :  { %12 = vsyncpa [#allocation3], 0  ;;  %s4625_s0 = inlined_call_operand.hbm [shape: f32[4,128], index: 0, kind: input, shape index: {}]   ;;  %s4626_s1 = inlined_call_operand.hbm [shape: f32[128,128], index: 1, kind: input, shape index: {}]   ;;  %s4627_s2 = inlined_call_operand.hbm [shape: f32[128,128], index: 2, kind: input, shape index: {}]   ;;  %s4628_s3 = inlined_call_operand.hbm [shape: f32[128,128], index: 3, kind: input, shape index: {}]   ;;  %s4629_s4 = inlined_call_operand.vmem [shape: f32[1,128], index: 4, kind: input, shape index: {}]   ;;  %s4630_s5 = inlined_call_operand.vmem [shape: f32[1,128], index: 5, kind: input, shape index: {}]   ;;  %s4631_s6 = inlined_call_operand.vmem [shape: f32[1,128], index: 6, kind: input, shape index: {}]   ;;  %s4632_s7 = inlined_call_operand.hbm [shape: f32[4,128], index: 7, kind: output, shape index: {}]  }
   0x1   :  { %13 = vsyncpa [#allocation6], 0 }
   0x2   :  { %14 = vsyncpa [#allocation9], 0 }
   0x3   :  { %15 = vsyncpa [#allocation4], 0  ;;  %s3624_s24 = smov [#allocation5]   ;;  %s3506_s28 = scalar_lea.hbm %s4626_s1, 2048 }
   0x4   :  { %s31_s25 = sshll.u32 %s3624_s24, 4  ;;  %p3507_p0 = scmp.ne.s32.totalorder %s4626_s1, %s3506_s28  ;;  %s32_s25 = int_to_ptr.vmem [resolvable:$true] %s31_s25 }
   0x5   :  { %p3510_p1 = scmp.lt.u32.totalorder %s3506_s28, %s4626_s1 }
   0x7   :  { %p3512_p2 = pnand %p3510_p1, %p3507_p0 }
   0x9   :  { %3515 = shalt.err (!%p3512_p2)
}
   0xa   :  { %s3516_s10 = scalar_lea.vmem %s32_s25, 2048  ;;  %p3521_p4 = scmp.lt.s32.totalorder %s32_s25, %s32_s25 }
   0xb   :  { %p3517_p3 = scmp.ne.s32.totalorder %s32_s25, %s3516_s10  ;;  %p3522_p5 = scmp.lt.s32.totalorder %s3516_s10, %s3516_s10 }
   0xd   :  { %p3523_p6 = por %p3522_p5, %p3521_p4 }
   0xf   :  { %p3524_p7 = pnand %p3523_p6, %p3517_p3 }
  0x11   :  { %3527 = shalt.err (!%p3524_p7)
}
  0x12   :  { %s3625_s11 = smov 128   ;;  %s3626_s12 = smov 8  }
  0x13   :  { %37 = dma.hbm_to_vmem [thread:$0]  %s4626_s1, 2048, %s32_s25, [#allocation6], %s3625_s11, %s3625_s11, %s3626_s12  }
  0x14   :  { %s3627_s15 = smov [#allocation2]   ;;  %s3628_s17 = smov [#allocation7]  }
  0x15   :  { %s22_s16 = sshll.u32 %s3627_s15, 4  ;;  %s43_s18 = sshll.u32 %s3628_s17, 4  ;;  %s23_s16 = int_to_ptr.vmem [resolvable:$true] %s22_s16  ;;  %s44_s18 = int_to_ptr.vmem [resolvable:$true] %s43_s18 }
  0x16   :  { %s3528_s21 = scalar_lea.hbm %s4625_s0, 64 }
  0x17   :  { %p3529_p8 = scmp.ne.s32.totalorder %s4625_s0, %s3528_s21  ;;  %p3532_p9 = scmp.lt.u32.totalorder %s3528_s21, %s4625_s0 }
  0x19   :  { %p3534_p10 = pnand %p3532_p9, %p3529_p8 }
  0x1b   :  { %3537 = shalt.err (!%p3534_p10)
}
  0x1c   :  { %s3538_s1 = scalar_lea.vmem %s23_s16, 64  ;;  %p3543_p12 = scmp.lt.s32.totalorder %s23_s16, %s23_s16 }
  0x1d   :  { %p3539_p11 = scmp.ne.s32.totalorder %s23_s16, %s3538_s1  ;;  %p3544_p13 = scmp.lt.s32.totalorder %s3538_s1, %s3538_s1 }
  0x1f   :  { %p3545_p0 = por %p3544_p13, %p3543_p12 }
  0x21   :  { %p3546_p1 = pnand %p3545_p0, %p3539_p11 }
  0x23   :  { %3549 = shalt.err (!%p3546_p1)
}
  0x24   :  { %25 = dma.hbm_to_vmem [thread:$0]  %s4625_s0, 64, %s23_s16, [#allocation3]  }
  0x25   :  { %s3550_s30 = scalar_lea.hbm %s4627_s2, 2048 }
  0x26   :  { %p3551_p2 = scmp.ne.s32.totalorder %s4627_s2, %s3550_s30  ;;  %p3554_p3 = scmp.lt.u32.totalorder %s3550_s30, %s4627_s2 }
  0x28   :  { %p3556_p4 = pnand %p3554_p3, %p3551_p2 }
  0x2a   :  { %3559 = shalt.err (!%p3556_p4)
}
  0x2b   :  { %s3560_s14 = scalar_lea.vmem %s44_s18, 2048  ;;  %p3565_p6 = scmp.lt.s32.totalorder %s44_s18, %s44_s18 }
  0x2c   :  { %p3561_p5 = scmp.ne.s32.totalorder %s44_s18, %s3560_s14  ;;  %p3566_p7 = scmp.lt.s32.totalorder %s3560_s14, %s3560_s14 }
  0x2e   :  { %p3567_p8 = por %p3566_p7, %p3565_p6 }
  0x30   :  { %p3568_p9 = pnand %p3567_p8, %p3561_p5 }
  0x32   :  { %3571 = shalt.err (!%p3568_p9)
}
  0x33   :  { %49 = dma.hbm_to_vmem [thread:$0]  %s4627_s2, 2048, %s44_s18, [#allocation6], %s3625_s11, %s3625_s11, %s3626_s12  }
  0x34   :  { %s3629_s16 = smov [#allocation8]   ;;  %s3572_s21 = scalar_lea.hbm %s4628_s3, 2048 }
  0x35   :  { %s55_s17 = sshll.u32 %s3629_s16, 4  ;;  %p3573_p10 = scmp.ne.s32.totalorder %s4628_s3, %s3572_s21  ;;  %s56_s17 = int_to_ptr.vmem [resolvable:$true] %s55_s17 }
  0x36   :  { %p3576_p11 = scmp.lt.u32.totalorder %s3572_s21, %s4628_s3 }
  0x38   :  { %p3578_p12 = pnand %p3576_p11, %p3573_p10 }
  0x3a   :  { %3581 = shalt.err (!%p3578_p12)
}
  0x3b   :  { %s3582_s1 = scalar_lea.vmem %s56_s17, 2048  ;;  %p3587_p0 = scmp.lt.s32.totalorder %s56_s17, %s56_s17 }
  0x3c   :  { %p3583_p13 = scmp.ne.s32.totalorder %s56_s17, %s3582_s1  ;;  %p3588_p1 = scmp.lt.s32.totalorder %s3582_s1, %s3582_s1 }
  0x3e   :  { %p3589_p2 = por %p3588_p1, %p3587_p0 }
  0x40   :  { %p3590_p3 = pnand %p3589_p2, %p3583_p13 }
  0x42   :  { %3593 = shalt.err (!%p3590_p3)
}
  0x43   :  { %61 = dma.hbm_to_vmem [thread:$0]  %s4628_s3, 2048, %s56_s17, [#allocation9], %s3625_s11, %s3625_s11, %s3626_s12  }
  0x44   :  { %3616 = dma.done.wait [#allocation3], 64  }
  0x45   :  { %3617 = vsyncadd [#allocation3], 4294967232 }
  0x46   :  { %3618 = dma.done.wait [#allocation6], 4096  }
  0x47   :  { %3619 = vsyncadd [#allocation6], 4294963200 }
  0x48   :  { %3620 = dma.done.wait [#allocation9], 2048  }
  0x49   :  { %3621 = vsyncadd [#allocation9], 4294965248  ;;  %v4649_v0 = vmov 0.0|0.0   ;;  %vm3631_vm0 = vmmov 0   ;;  %v4643_v1 = vmov 0.0   ;;  %v81_v2 = vld [vmem:[#allocation5] sm:$0xff] }
  0x4a   :  { %3032 = vmatprep.subr.bf16.mxu1 %v4649_v0  ;;  %3104 = vmatprep.subr.bf16.mxu0 %v4649_v0  ;;  %v82_v3 = vld [vmem:[#allocation5 + $0x8] sm:$0xff]  ;;  %v83_v4 = vld [vmem:[#allocation5 + $0x10] sm:$0xff]  ;;  %v105_v5 = vand.u32 4294901760, %v81_v2  ;;  %v84_v7 = vld [vmem:[#allocation5 + $0x18] sm:$0xff]  ;;  %s3633_s27 = smov [#allocation10]  }
  0x4b   :  { %2434 = vmatprep.mubr.msk.f32.mxu1 %vm3631_vm0, %v4643_v1  ;;  %2539 = vmatprep.mubr.msk.f32.mxu0 %vm3631_vm0, %v4643_v1  ;;  %v108_v6 = vand.u32 4294901760, %v82_v3  ;;  %v111_v8 = vand.u32 4294901760, %v83_v4  ;;  %v114_v9 = vand.u32 4294901760, %v84_v7  ;;  %v85_v10 = vld [vmem:[#allocation5 + $0x20] sm:$0xff]  ;;  %v86_v11 = vld [vmem:[#allocation5 + $0x28] sm:$0xff]  ;;  %v3745_v16 = vld [vmem:[#allocation5 + $0x30] sm:$0xff] }
  0x4c   :  { %v117_v14 = vand.u32 4294901760, %v85_v10  ;;  %v120_v15 = vand.u32 4294901760, %v86_v11  ;;  %v3747_v17 = vld [vmem:[#allocation5 + $0x38] sm:$0xff]  ;;  %v123_v19 = vand.u32 4294901760, %v3745_v16  ;;  %v89_v21 = vld [vmem:[#allocation5 + $0x40] sm:$0xff]  ;;  %v90_v22 = vld [vmem:[#allocation5 + $0x48] sm:$0xff]  ;;  %v3765_v27 = vsub.f32 %v81_v2, %v105_v5 }
  0x4d   :  { %v3737_v12 = vpack.c.bf16 %v108_v6, %v105_v5  ;;  %v3741_v13 = vpack.c.bf16 %v114_v9, %v111_v8  ;;  %v126_v20 = vand.u32 4294901760, %v3747_v17  ;;  %v129_v24 = vand.u32 4294901760, %v89_v21  ;;  %v80_v26 = vld [vmem:[#allocation2] sm:$0xf]  ;;  %v3771_v29 = vld [vmem:[#allocation5 + $0x50] sm:$0xff]  ;;  %v3789_v37 = vld [vmem:[#allocation5 + $0x60] sm:$0xff] }
  0x4e   :  { %v3751_v18 = vpack.c.bf16 %v120_v15, %v117_v14  ;;  %v132_v25 = vand.u32 4294901760, %v90_v22  ;;  %v3767_v28 = vsub.f32 %v82_v3, %v108_v6  ;;  %v3773_v30 = vld [vmem:[#allocation5 + $0x58] sm:$0xff]  ;;  %v3775_v31 = vand.u32 4294901760, %v80_v26  ;;  %v3791_v38 = vld [vmem:[#allocation5 + $0x68] sm:$0xff]  ;;  %v3810_v46 = vld [vmem:[#allocation5 + $0x70] sm:$0xff]  ;;  %s2082_s28 = sshll.u32 %s3633_s27, 4  ;;  %s2083_s28 = int_to_ptr.vmem [resolvable:$true] %s2082_s28 }
  0x4f   :  { %3034 = vmatpush3.bf16.msra.mxu1 %v3737_v12  ;;  %3106 = vmatpush3.bf16.msra.mxu0 %v3737_v12  ;;  %v3763_v23 = vpack.c.bf16 %v126_v20, %v123_v19  ;;  %v3777_v32 = vsub.f32 %v83_v4, %v111_v8  ;;  %v135_v34 = vand.u32 4294901760, %v3771_v29  ;;  %v138_v35 = vand.u32 4294901760, %v3773_v30  ;;  %v3812_v47 = vld [vmem:[#allocation5 + $0x78] sm:$0xff]  ;;  %v3843_v63 = vld [vmem:[#allocation7] sm:$0xff]  ;;  %v3855_v4 = vld [vmem:[#allocation7 + $0x8] sm:$0xff]  ;;  %s3594_s29 = scalar_lea.vmem %s2083_s28, 64  ;;  %p3599_p5 = scmp.lt.s32.totalorder %s2083_s28, %s2083_s28 }
  0x50   :  { %3035 = vmatprep.subr.bf16.mxu1 %v4649_v0  ;;  %3107 = vmatprep.subr.bf16.mxu0 %v4649_v0  ;;  %v3781_v33 = vpack.c.bf16 %v132_v25, %v129_v24  ;;  %v3785_v36 = vsub.f32 %v84_v7, %v114_v9  ;;  %v198_v39 = vand.u32 4294901760, %v3765_v27  ;;  %v205_v40 = vand.u32 4294901760, %v3767_v28  ;;  %v3868_v9 = vld [vmem:[#allocation7 + $0x10] sm:$0xff]  ;;  %p3595_p4 = scmp.ne.s32.totalorder %s2083_s28, %s3594_s29  ;;  %p3600_p6 = scmp.lt.s32.totalorder %s3594_s29, %s3594_s29 }
  0x51   :  { %v3795_v41 = vsub.f32 %v85_v10, %v117_v14  ;;  %v3798_v42 = vsub.f32 %v80_v26, %v3775_v31  ;;  %v3806_v43 = vpack.c.bf16 %v138_v35, %v135_v34  ;;  %v141_v44 = vand.u32 4294901760, %v3789_v37  ;;  %v3870_v10 = vld [vmem:[#allocation7 + $0x18] sm:$0xff] }
  0x52   :  { %v4645_v45 = vand.u32 4294901760, %v3791_v38  ;;  %v212_v48 = vand.u32 4294901760, %v3777_v32  ;;  %v3815_v49 = vsub.f32 %v86_v11, %v120_v15  ;;  %v199_v50 = vsub.f32 %v3765_v27, %v198_v39  ;;  %p3601_p7 = por %p3600_p6, %p3599_p5 }
  0x53   :  { %3037 = vmatpush3.bf16.msra.mxu1 %v3741_v13  ;;  %3109 = vmatpush3.bf16.msra.mxu0 %v3741_v13  ;;  %v206_v51 = vsub.f32 %v3767_v28, %v205_v40  ;;  %v219_v52 = vand.u32 4294901760, %v3785_v36  ;;  %v4636_v53 = vand.u32 4294901760, %v3810_v46  ;;  %v4634_v54 = vand.u32 4294901760, %v3812_v47 }
  0x54   :  { %3038 = vmatprep.subr.bf16.mxu1 %v4649_v0  ;;  %3110 = vmatprep.subr.bf16.mxu0 %v4649_v0  ;;  %v187_v55 = vand.u32 4294901760, %v3798_v42  ;;  %v3831_v56 = vpack.c.bf16 %v4645_v45, %v141_v44  ;;  %v3836_v57 = vsub.f32 %v3777_v32, %v212_v48  ;;  %v4640_v58 = vand.u32 4294901760, %v3795_v41  ;;  %p3602_p8 = pnand %p3601_p7, %p3595_p4 }
  0x55   :  { %v200_v59 = vand.u32 4294901760, %v199_v50  ;;  %v207_v60 = vand.u32 4294901760, %v206_v51  ;;  %v220_v61 = vsub.f32 %v3785_v36, %v219_v52  ;;  %v4638_v62 = vand.u32 4294901760, %v3815_v49  ;;  %v3899_v51 = vld [vmem:[#allocation7 + $0x38] sm:$0xff] }
  0x56   :  { %v3848_v2 = vsub.f32 %v3745_v16, %v123_v19  ;;  %v3853_v3 = vsub.f32 %v3747_v17, %v126_v20  ;;  %v3857_v5 = vsub.f32 %v89_v21, %v129_v24  ;;  %v3859_v6 = vsub.f32 %v90_v22, %v132_v25  ;;  %v3879_v17 = vld [vmem:[#allocation7 + $0x20] sm:$0xff]  ;;  %v3881_v19 = vld [vmem:[#allocation7 + $0x28] sm:$0xff]  ;;  %v3889_v25 = vld [vmem:[#allocation7 + $0x30] sm:$0xff] }
  0x57   :  { %3040 = vmatpush3.bf16.msra.mxu1 %v3751_v18  ;;  %3112 = vmatpush3.bf16.msra.mxu0 %v3751_v18  ;;  %v3865_v7 = vpack.c.bf16 %v4634_v54, %v4636_v53  ;;  %v188_v8 = vsub.f32 %v3798_v42, %v187_v55  ;;  %v3129_v11 = vpack.c.bf16 %v205_v40, %v198_v39  ;;  %v214_v14 = vand.u32 4294901760, %v3836_v57 }
  0x58   :  { %3041 = vmatprep.subr.bf16.mxu1 %v4649_v0  ;;  %3113 = vmatprep.subr.bf16.mxu0 %v4649_v0  ;;  %v227_v15 = vsub.f32 %v3795_v41, %v4640_v58  ;;  %v4633_v16 = vand.u32 4294901760, %v3843_v63  ;;  %v3057_v20 = vpack.c.bf16 %v207_v60, %v200_v59  ;;  %v221_v21 = vand.u32 4294901760, %v220_v61 }
  0x59   :  { %v234_v22 = vsub.f32 %v3815_v49, %v4638_v62  ;;  %v4635_v24 = vand.u32 4294901760, %v3855_v4  ;;  %v240_v26 = vand.u32 4294901760, %v3848_v2  ;;  %v4637_v40 = vand.u32 4294901760, %v3868_v9 }
  0x5a   :  { %v3895_v39 = vsub.f32 %v3843_v63, %v4633_v16  ;;  %v4639_v50 = vand.u32 4294901760, %v3870_v10  ;;  %v189_v57 = vand.u32 4294901760, %v188_v8  ;;  %v4641_v60 = vand.u32 4294901760, %v3879_v17 }
  0x5b   :  { %3043 = vmatpush3.bf16.msra.mxu1 %v3763_v23  ;;  %3115 = vmatpush3.bf16.msra.mxu0 %v3763_v23  ;;  %v3904_v59 = vsub.f32 %v3855_v4, %v4635_v24  ;;  %v4642_v61 = vand.u32 4294901760, %v3881_v19  ;;  %v247_v16 = vand.u32 4294901760, %v3853_v3  ;;  %v3914_v54 = vsub.f32 %v3868_v9, %v4637_v40 }
  0x5c   :  { %3044 = vmatprep.subr.bf16.mxu1 %v4649_v0  ;;  %3116 = vmatprep.subr.bf16.mxu0 %v4649_v0  ;;  %v3919_v8 = vsub.f32 %v3870_v10, %v4639_v50  ;;  %v4647_v24 = vand.u32 4294901760, %v3889_v25  ;;  %v3927_v53 = vsub.f32 %v3879_v17, %v4641_v60  ;;  %v4646_v62 = vand.u32 4294901760, %v3899_v51 }
  0x5d   :  { %v3932_v40 = vsub.f32 %v3881_v19, %v4642_v61  ;;  %v3938_v50 = vsub.f32 %v3771_v29, %v135_v34  ;;  %v3943_v58 = vsub.f32 %v3773_v30, %v138_v35  ;;  %v3132_v60 = vpack.c.bf16 %v219_v52, %v212_v48 }
  0x5e   :  { %v3950_v61 = vsub.f32 %v3889_v25, %v4647_v24  ;;  %v228_v1 = vand.u32 4294901760, %v227_v15  ;;  %v235_v45 = vand.u32 4294901760, %v234_v22  ;;  %v254_v29 = vand.u32 4294901760, %v3857_v5 }
  0x5f   :  { %3046 = vmatpush3.bf16.msra.mxu1 %v3781_v33  ;;  %3118 = vmatpush3.bf16.msra.mxu0 %v3781_v33  ;;  %v3956_v34 = vsub.f32 %v3899_v51, %v4646_v62  ;;  %v3060_v30 = vpack.c.bf16 %v221_v21, %v214_v14  ;;  %v241_v35 = vsub.f32 %v3848_v2, %v240_v26  ;;  %v261_v52 = vand.u32 4294901760, %v3859_v6 }
  0x60   :  { %3047 = vmatprep.subr.bf16.mxu1 %v4649_v0  ;;  %3119 = vmatprep.subr.bf16.mxu0 %v4649_v0  ;;  %4668 = vst [vmem:[#allocation15_spill] sm:$0xff] %v3950_v61  ;;  %v248_v48 = vsub.f32 %v3853_v3, %v247_v16  ;;  %v4670_v15 = vand.u32 4294901760, %v3791_v38  ;;  %v4671_v14 = vmov 0.0   ;;  %v4672_v21 = vand.u32 4294901760, %v3795_v41 }
  0x61   :  { %4669 = vst [vmem:[#allocation16_spill] sm:$0xff] %v3956_v34  ;;  %v4673_v22 = vand.u32 4294901760, %v3815_v49  ;;  %v262_v62 = vsub.f32 %v3859_v6, %v261_v52  ;;  %v275_v24 = vand.u32 4294901760, %v3943_v58 }
  0x63   :  { %3049 = vmatpush3.bf16.msra.mxu1 %v3806_v43  ;;  %3121 = vmatpush3.bf16.msra.mxu0 %v3806_v43  ;;  %v276_v61 = vsub.f32 %v3943_v58, %v275_v24 }
  0x64   :  { %3050 = vmatprep.subr.bf16.mxu1 %v4649_v0  ;;  %3122 = vmatprep.subr.bf16.mxu0 %v4649_v0 }
  0x67   :  { %3052 = vmatpush3.bf16.msra.mxu1 %v3831_v56  ;;  %3124 = vmatpush3.bf16.msra.mxu0 %v3831_v56 }
  0x68   :  { %3053 = vmatprep.subr.bf16.mxu1 %v4649_v0  ;;  %3125 = vmatprep.subr.bf16.mxu0 %v4649_v0 }
  0x6b   :  { %3055 = vmatpush3.bf16.msra.mxu1 %v3865_v7  ;;  %3127 = vmatpush3.bf16.msra.mxu0 %v3865_v7 }
  0x6c   :  { %3056 = vmatprep.subr.bf16.mxu1 %v4649_v0  ;;  %3128 = vmatprep.subr.bf16.mxu0 %v4649_v0 }
  0x6e   :  { %2435 = vmatmul.mubr.f32.vlgmr.msra.gmra.mrb[0].mxu1 %v189_v57  ;;  %2540 = vmatmul.mubr.f32.vlgmr.msra.gmra.mrb[0].mxu0 %v187_v55  ;;  %v3966_v55 = vsub.f32 %v3789_v37, %v141_v44  ;;  %v3135_v57 = vpack.c.bf16 %v4673_v22, %v4672_v21  ;;  %v255_v37 = vsub.f32 %v3857_v5, %v254_v29  ;;  %v268_v44 = vand.u32 4294901760, %v3938_v50 }
  0x6f   :  { %3058 = vmatpush3.bf16.msra.mxu1 %v3057_v20  ;;  %3130 = vmatpush3.bf16.msra.mxu0 %v3129_v11  ;;  %v3971_v11 = vsub.f32 %v3791_v38, %v4670_v15  ;;  %v3063_v20 = vpack.c.bf16 %v235_v45, %v228_v1  ;;  %v242_v38 = vand.u32 4294901760, %v241_v35  ;;  %v249_v15 = vand.u32 4294901760, %v248_v48 }
  0x70   :  { %3059 = vmatprep.subr.bf16.mxu1 %v4649_v0  ;;  %3131 = vmatprep.subr.bf16.mxu0 %v4649_v0  ;;  %v4674_v1 = vand.u32 4294901760, %v3810_v46  ;;  %v4675_v21 = vand.u32 4294901760, %v3812_v47  ;;  %v256_v35 = vand.u32 4294901760, %v255_v37  ;;  %v269_v48 = vsub.f32 %v3938_v50, %v268_v44 }
  0x71   :  { %2469 = vmatprep.mubr.msk.f32.mxu1 %vm3631_vm0, %v4671_v14  ;;  %2574 = vmatprep.mubr.msk.f32.mxu0 %vm3631_vm0, %v4671_v14  ;;  %v282_v22 = vand.u32 4294901760, %v3966_v55  ;;  %v3066_v34 = vpack.c.bf16 %v249_v15, %v242_v38  ;;  %v3144_v38 = vpack.c.bf16 %v275_v24, %v268_v44 }
  0x72   :  { %v3990_v45 = vsub.f32 %v3810_v46, %v4674_v1  ;;  %v289_v46 = vand.u32 4294901760, %v3971_v11  ;;  %v4676_v1 = vmov 0.0|0.0  }
  0x73   :  { %3061 = vmatpush3.bf16.msra.mxu1 %v3060_v30  ;;  %3133 = vmatpush3.bf16.msra.mxu0 %v3132_v60  ;;  %v3995_v30 = vsub.f32 %v3812_v47, %v4675_v21  ;;  %v3138_v60 = vpack.c.bf16 %v247_v16, %v240_v26  ;;  %v3141_v47 = vpack.c.bf16 %v261_v52, %v254_v29  ;;  %v270_v21 = vand.u32 4294901760, %v269_v48 }
  0x74   :  { %3062 = vmatprep.subr.bf16.mxu1 %v4649_v0  ;;  %3134 = vmatprep.subr.bf16.mxu0 %v4649_v0  ;;  %v263_v0 = vand.u32 4294901760, %v262_v62  ;;  %v283_v16 = vsub.f32 %v3966_v55, %v282_v22  ;;  %v296_v26 = vand.u32 4294901760, %v3990_v45  ;;  %v290_v62 = vsub.f32 %v3971_v11, %v289_v46 }
  0x75   :  { %v303_v37 = vand.u32 4294901760, %v3995_v30 }
  0x76   :  { %v284_v15 = vand.u32 4294901760, %v283_v16  ;;  %v291_v52 = vand.u32 4294901760, %v290_v62  ;;  %v297_v48 = vsub.f32 %v3990_v45, %v296_v26 }
  0x77   :  { %3064 = vmatpush3.bf16.msra.mxu1 %v3063_v20  ;;  %3136 = vmatpush3.bf16.msra.mxu0 %v3135_v57  ;;  %v3069_v20 = vpack.c.bf16 %v263_v0, %v256_v35  ;;  %v277_v57 = vand.u32 4294901760, %v276_v61  ;;  %v3147_v61 = vpack.c.bf16 %v289_v46, %v282_v22  ;;  %v3150_v44 = vpack.c.bf16 %v303_v37, %v296_v26  ;;  %v761_v46 = vld [vmem:[#allocation7 + $0x78] sm:$0xff] }
  0x78   :  { %3065 = vmatprep.subr.bf16.mxu1 %v4676_v1  ;;  %3137 = vmatprep.subr.bf16.mxu0 %v4676_v1  ;;  %v3075_v0 = vpack.c.bf16 %v291_v52, %v284_v15  ;;  %v3084_v22 = vpack.c.bf16 %v3785_v36, %v3777_v32  ;;  %v4677_v32 = vand.u32 4294901760, %v3843_v63  ;;  %v4684_v63 = vand.u32 4294901760, %v3899_v51  ;;  %v759_v51 = vld [vmem:[#allocation7 + $0x68] sm:$0xff] }
  0x79   :  { %v3072_v29 = vpack.c.bf16 %v277_v57, %v270_v21  ;;  %v815_v16 = vand.u32 4294901760, %v761_v46  ;;  %v863_v26 = vand.u32 4294901760, %v3895_v39 }
  0x7b   :  { %3067 = vmatpush3.bf16.msra.mxu1 %v3066_v34  ;;  %3139 = vmatpush3.bf16.msra.mxu0 %v3138_v60  ;;  %v304_v34 = vsub.f32 %v3995_v30, %v303_v37  ;;  %v298_v60 = vand.u32 4294901760, %v297_v48  ;;  %v864_v62 = vsub.f32 %v3895_v39, %v863_v26 }
  0x7c   :  { %3068 = vmatprep.subr.bf16.mxu1 %v4676_v1  ;;  %3140 = vmatprep.subr.bf16.mxu0 %v4676_v1 }
  0x7d   :  { %v305_v35 = vand.u32 4294901760, %v304_v34 }
  0x7f   :  { %3070 = vmatpush3.bf16.msra.mxu1 %v3069_v20  ;;  %3142 = vmatpush3.bf16.msra.mxu0 %v3141_v47  ;;  %v3078_v24 = vpack.c.bf16 %v305_v35, %v298_v60  ;;  %v3081_v47 = vpack.c.bf16 %v3767_v28, %v3765_v27  ;;  %v3087_v27 = vpack.c.bf16 %v3815_v49, %v3795_v41  ;;  %v4679_v41 = vand.u32 4294901760, %v3868_v9  ;;  %v756_v9 = vld [vmem:[#allocation7 + $0x50] sm:$0xff] }
  0x80   :  { %3071 = vmatprep.subr.bf16.mxu1 %v4676_v1  ;;  %3143 = vmatprep.subr.bf16.mxu0 %v4676_v1  ;;  %v3102_v28 = vpack.c.bf16 %v3995_v30, %v3990_v45  ;;  %v760_v30 = vld [vmem:[#allocation7 + $0x70] sm:$0xff]  ;;  %v870_v20 = vand.u32 4294901760, %v3904_v59  ;;  %v865_v60 = vand.u32 4294901760, %v864_v62 }
  0x81   :  { %v812_v21 = vand.u32 4294901760, %v760_v30 }
  0x82   :  { %v871_v37 = vsub.f32 %v3904_v59, %v870_v20 }
  0x83   :  { %3073 = vmatpush3.bf16.msra.mxu1 %v3072_v29  ;;  %3145 = vmatpush3.bf16.msra.mxu0 %v3144_v38  ;;  %v4117_v57 = vpack.c.bf16 %v815_v16, %v812_v21 }
  0x84   :  { %3074 = vmatprep.subr.bf16.mxu1 %v4676_v1  ;;  %3146 = vmatprep.subr.bf16.mxu0 %v4676_v1  ;;  %v872_v35 = vand.u32 4294901760, %v871_v37 }
  0x87   :  { %3076 = vmatpush3.bf16.msra.mxu1 %v3075_v0  ;;  %3148 = vmatpush3.bf16.msra.mxu0 %v3147_v61  ;;  %v4138_v0 = vsub.f32 %v760_v30, %v812_v21  ;;  %v4140_v61 = vsub.f32 %v761_v46, %v815_v16 }
  0x88   :  { %3077 = vmatprep.subr.bf16.mxu1 %v4676_v1  ;;  %3149 = vmatprep.subr.bf16.mxu0 %v4676_v1 }
  0x8b   :  { %3079 = vmatpush3.bf16.msra.mxu1 %v3078_v24  ;;  %3151 = vmatpush3.bf16.msra.mxu0 %v3150_v44  ;;  %v877_v24 = vand.u32 4294901760, %v3914_v54  ;;  %v884_v44 = vand.u32 4294901760, %v3919_v8 }
  0x8c   :  { %3080 = vmatprep.subr.bf16.mxu1 %v4676_v1  ;;  %3152 = vmatprep.subr.bf16.mxu0 %v4676_v1 }
  0x8e   :  { %2470 = vmatmul.mubr.f32.vlgmr.msra.gmra.mrb[0].mxu1 %v3775_v31  ;;  %2575 = vmatmul.mubr.f32.vlgmr.msra.gmra.mrb[0].mxu0 %v3775_v31 }
  0x8f   :  { %3082 = vmatpush3.bf16.msra.mxu1 %v3081_v47  ;;  %3154 = vmatpush3.bf16.msra.mxu0 %v3737_v12  ;;  %v3090_v12 = vpack.c.bf16 %v3853_v3, %v3848_v2  ;;  %v754_v3 = vld [vmem:[#allocation7 + $0x40] sm:$0xff]  ;;  %v4145_v47 = vpack.c.bf16 %v872_v35, %v865_v60 }
  0x90   :  { %3083 = vmatprep.subr.bf16.mxu1 %v4676_v1  ;;  %3155 = vmatprep.subr.bf16.mxu0 %v4676_v1 }
  0x91   :  { %2504 = vmatprep.mubr.msk.f32.mxu1 %vm3631_vm0, %v4671_v14  ;;  %2609 = vmatprep.mubr.msk.f32.mxu0 %vm3631_vm0, %v4671_v14 }
  0x93   :  { %3085 = vmatpush3.bf16.msra.mxu1 %v3084_v22  ;;  %3157 = vmatpush3.bf16.msra.mxu0 %v3741_v13  ;;  %v3093_v13 = vpack.c.bf16 %v3859_v6, %v3857_v5  ;;  %v794_v5 = vand.u32 4294901760, %v754_v3  ;;  %v878_v22 = vsub.f32 %v3914_v54, %v877_v24 }
  0x94   :  { %3086 = vmatprep.subr.bf16.mxu1 %v4676_v1  ;;  %3158 = vmatprep.subr.bf16.mxu0 %v4676_v1 }
  0x95   :  { %v4125_v38 = vsub.f32 %v754_v3, %v794_v5 }
  0x97   :  { %3088 = vmatpush3.bf16.msra.mxu1 %v3087_v27  ;;  %3160 = vmatpush3.bf16.msra.mxu0 %v3751_v18  ;;  %v3096_v18 = vpack.c.bf16 %v3943_v58, %v3938_v50  ;;  %v4683_v58 = vand.u32 4294901760, %v3889_v25  ;;  %v758_v50 = vld [vmem:[#allocation7 + $0x60] sm:$0xff]  ;;  %v885_v27 = vsub.f32 %v3919_v8, %v884_v44 }
  0x98   :  { %3089 = vmatprep.subr.bf16.mxu1 %v4676_v1  ;;  %3161 = vmatprep.subr.bf16.mxu0 %v4676_v1 }
  0x99   :  { %v4098_v2 = vpack.c.bf16 %v4684_v63, %v4683_v58  ;;  %v4686_v58 = vld [vmem:[#allocation16_spill] sm:$0xff] }
  0x9a   :  { %v4660_v63 = vand.u32 4294901760, %v4686_v58 }
  0x9b   :  { %3091 = vmatpush3.bf16.msra.mxu1 %v3090_v12  ;;  %3163 = vmatpush3.bf16.msra.mxu0 %v3763_v23  ;;  %v3099_v23 = vpack.c.bf16 %v3971_v11, %v3966_v55  ;;  %v806_v55 = vand.u32 4294901760, %v758_v50  ;;  %v809_v11 = vand.u32 4294901760, %v759_v51  ;;  %v4663_v12 = vand.u32 4294901760, %v3927_v53 }
  0x9c   :  { %3092 = vmatprep.subr.bf16.mxu1 %v4676_v1  ;;  %3164 = vmatprep.subr.bf16.mxu0 %v4676_v1 }
  0x9d   :  { %v4111_v45 = vpack.c.bf16 %v809_v11, %v806_v55  ;;  %v4134_v48 = vsub.f32 %v758_v50, %v806_v55  ;;  %v4136_v34 = vsub.f32 %v759_v51, %v809_v11 }
  0x9f   :  { %3094 = vmatpush3.bf16.msra.mxu1 %v3093_v13  ;;  %3166 = vmatpush3.bf16.msra.mxu0 %v3781_v33  ;;  %v4678_v33 = vand.u32 4294901760, %v3855_v4  ;;  %v755_v4 = vld [vmem:[#allocation7 + $0x48] sm:$0xff]  ;;  %v4662_v13 = vand.u32 4294901760, %v3932_v40  ;;  %v4655_v35 = vand.u32 4294901760, %v4134_v48 }
  0xa0   :  { %3095 = vmatprep.subr.bf16.mxu1 %v4676_v1  ;;  %3167 = vmatprep.subr.bf16.mxu0 %v4676_v1  ;;  %v797_v6 = vand.u32 4294901760, %v755_v4 }
  0xa1   :  { %v4067_v36 = vpack.c.bf16 %v4678_v33, %v4677_v32  ;;  %v899_v32 = vsub.f32 %v3932_v40, %v4662_v13 }
  0xa2   :  { %v4127_v15 = vsub.f32 %v755_v4, %v797_v6 }
  0xa3   :  { %3097 = vmatpush3.bf16.msra.mxu1 %v3096_v18  ;;  %3169 = vmatpush3.bf16.msra.mxu0 %v3806_v43  ;;  %v4680_v43 = vand.u32 4294901760, %v3870_v10  ;;  %v757_v10 = vld [vmem:[#allocation7 + $0x58] sm:$0xff]  ;;  %v879_v18 = vand.u32 4294901760, %v878_v22  ;;  %v4654_v22 = vand.u32 4294901760, %v4136_v34 }
  0xa4   :  { %3098 = vmatprep.subr.bf16.mxu1 %v4676_v1  ;;  %3170 = vmatprep.subr.bf16.mxu0 %v4676_v1 }
  0xa5   :  { %v4078_v49 = vpack.c.bf16 %v4680_v43, %v4679_v41  ;;  %v900_v43 = vand.u32 4294901760, %v899_v32 }
  0xa7   :  { %3100 = vmatpush3.bf16.msra.mxu1 %v3099_v23  ;;  %3172 = vmatpush3.bf16.msra.mxu0 %v3831_v56  ;;  %v886_v23 = vand.u32 4294901760, %v885_v27 }
  0xa8   :  { %3101 = vmatprep.subr.bf16.mxu1 %v4676_v1  ;;  %3173 = vmatprep.subr.bf16.mxu0 %v4676_v1 }
  0xa9   :  { %v4161_v33 = vpack.c.bf16 %v886_v23, %v879_v18  ;;  %v948_v18 = vsub.f32 %v4134_v48, %v4655_v35  ;;  %v955_v23 = vsub.f32 %v4136_v34, %v4654_v22 }
  0xab   :  { %3103 = vmatpush3.bf16.msra.mxu1 %v3102_v28  ;;  %3175 = vmatpush3.bf16.msra.mxu0 %v3865_v7  ;;  %v4103_v7 = vpack.c.bf16 %v797_v6, %v794_v5  ;;  %v892_v28 = vsub.f32 %v3927_v53, %v4663_v12  ;;  %v913_v5 = vsub.f32 %v4686_v58, %v4660_v63  ;;  %v956_v32 = vand.u32 4294901760, %v955_v23 }
  0xac   :  { %3176 = vmatprep.subr.bf16.mxu1 %v4676_v1  ;;  %3320 = vmatprep.subr.bf16.mxu0 %v4676_v1  ;;  %v3246_v23 = vpack.c.bf16 %v4140_v61, %v4138_v0 }
  0xad   :  { %v893_v41 = vand.u32 4294901760, %v892_v28  ;;  %v949_v28 = vand.u32 4294901760, %v948_v18  ;;  %v3243_v18 = vpack.c.bf16 %v4136_v34, %v4134_v48 }
  0xae   :  { %2505 = vmatmul.mubr.f32.vlgmr.msra.gmra.mrb[0].mxu1 %v3798_v42  ;;  %2610 = vmatmul.mubr.f32.vlgmr.msra.gmra.mrb[0].mxu0 %v3775_v31  ;;  %v4681_v31 = vand.u32 4294901760, %v3879_v17  ;;  %v4682_v42 = vand.u32 4294901760, %v3881_v19  ;;  %v800_v17 = vand.u32 4294901760, %v756_v9  ;;  %v803_v19 = vand.u32 4294901760, %v757_v10 }
  0xaf   :  { %3178 = vmatpush3.bf16.msra.mxu1 %v4067_v36  ;;  %2644 = vmatprep.mubr.msk.f32.mxu1 %vm3631_vm0, %v4671_v14  ;;  %v3207_v3 = vpack.c.bf16 %v900_v43, %v893_v41  ;;  %v4653_v41 = vand.u32 4294901760, %v4138_v0  ;;  %v4652_v43 = vand.u32 4294901760, %v4140_v61 }
  0xb0   :  { %3179 = vmatprep.subr.bf16.mxu1 %v4676_v1  ;;  %2854 = vmatprep.mubr.msk.f32.mxu0 %vm3631_vm0, %v4671_v14  ;;  %v4090_v56 = vpack.c.bf16 %v4682_v42, %v4681_v31  ;;  %v4107_v25 = vpack.c.bf16 %v803_v19, %v800_v17  ;;  %v4129_v29 = vsub.f32 %v756_v9, %v800_v17  ;;  %v4685_v31 = vld [vmem:[#allocation15_spill] sm:$0xff]  ;;  %v914_v9 = vand.u32 4294901760, %v913_v5 }
  0xb1   :  { %v4131_v52 = vsub.f32 %v757_v10, %v803_v19  ;;  %v4661_v42 = vand.u32 4294901760, %v4685_v31  ;;  %v4659_v10 = vand.u32 4294901760, %v4125_v38  ;;  %v4658_v17 = vand.u32 4294901760, %v4127_v15 }
  0xb2   :  { %v4657_v30 = vand.u32 4294901760, %v4129_v29  ;;  %v962_v5 = vsub.f32 %v4138_v0, %v4653_v41 }
  0xb3   :  { %3181 = vmatpush3.bf16.msra.mxu1 %v4078_v49  ;;  %v906_v4 = vsub.f32 %v4685_v31, %v4661_v42  ;;  %v920_v50 = vsub.f32 %v4125_v38, %v4659_v10  ;;  %v927_v51 = vsub.f32 %v4127_v15, %v4658_v17  ;;  %v4656_v46 = vand.u32 4294901760, %v4131_v52  ;;  %v1420_v10 = vld [vmem:[#allocation8 + $0x48] sm:$0xff] }
  0xb4   :  { %3182 = vmatprep.subr.bf16.mxu1 %v4676_v1  ;;  %v934_v16 = vsub.f32 %v4129_v29, %v4657_v30 }
  0xb5   :  { %v907_v6 = vand.u32 4294901760, %v906_v4  ;;  %v921_v55 = vand.u32 4294901760, %v920_v50  ;;  %v928_v11 = vand.u32 4294901760, %v927_v51  ;;  %v941_v62 = vsub.f32 %v4131_v52, %v4656_v46 }
  0xb6   :  { %v935_v37 = vand.u32 4294901760, %v934_v16  ;;  %v3219_v4 = vpack.c.bf16 %v956_v32, %v949_v28  ;;  %v3231_v16 = vpack.c.bf16 %v3932_v40, %v3927_v53  ;;  %v2093_v28 = vld [vmem:[%s4629_s4] ss:$0 sm:$0xff] }
  0xb7   :  { %3184 = vmatpush3.bf16.msra.mxu1 %v4090_v56  ;;  %v3210_v19 = vpack.c.bf16 %v914_v9, %v907_v6  ;;  %v3213_v21 = vpack.c.bf16 %v928_v11, %v921_v55  ;;  %v942_v60 = vand.u32 4294901760, %v941_v62  ;;  %v969_v6 = vsub.f32 %v4140_v61, %v4652_v43 }
  0xb8   :  { %3185 = vmatprep.subr.bf16.mxu1 %v4676_v1  ;;  %v963_v9 = vand.u32 4294901760, %v962_v5  ;;  %v3225_v55 = vpack.c.bf16 %v3904_v59, %v3895_v39  ;;  %v3228_v11 = vpack.c.bf16 %v3919_v8, %v3914_v54  ;;  %v3234_v62 = vpack.c.bf16 %v4686_v58, %v4685_v31 }
  0xb9   :  { %v3216_v27 = vpack.c.bf16 %v942_v60, %v935_v37  ;;  %v970_v50 = vand.u32 4294901760, %v969_v6  ;;  %v3237_v37 = vpack.c.bf16 %v4127_v15, %v4125_v38  ;;  %v3240_v60 = vpack.c.bf16 %v4131_v52, %v4129_v29 }
  0xba   :  { %v4687_v39 = vand.u32 4294901760, %v3927_v53  ;;  %v4688_v59 = vand.u32 4294901760, %v3932_v40  ;;  %v4690_v54 = vand.u32 4294901760, %v4686_v58  ;;  %v4693_v53 = vand.u32 4294901760, %v4129_v29 }
  0xbb   :  { %3187 = vmatpush3.bf16.msra.mxu1 %v4098_v2  ;;  %v3222_v51 = vpack.c.bf16 %v970_v50, %v963_v9  ;;  %v4694_v40 = vand.u32 4294901760, %v4131_v52  ;;  %v4696_v58 = vand.u32 4294901760, %v4136_v34  ;;  %v1424_v52 = vld [vmem:[#allocation8 + $0x68] sm:$0xff]  ;;  %v1425_v34 = vld [vmem:[#allocation8 + $0x70] sm:$0xff] }
  0xbc   :  { %3188 = vmatprep.subr.bf16.mxu1 %v4676_v1 }
  0xbf   :  { %3190 = vmatpush3.bf16.msra.mxu1 %v4103_v7 }
  0xc0   :  { %3191 = vmatprep.subr.bf16.mxu1 %v4676_v1 }
  0xc3   :  { %3193 = vmatpush3.bf16.msra.mxu1 %v4107_v25 }
  0xc4   :  { %3194 = vmatprep.subr.bf16.mxu1 %v4676_v1 }
  0xc7   :  { %3196 = vmatpush3.bf16.msra.mxu1 %v4111_v45 }
  0xc8   :  { %3197 = vmatprep.subr.bf16.mxu1 %v4676_v1 }
  0xcb   :  { %3199 = vmatpush3.bf16.msra.mxu1 %v4117_v57 }
  0xcc   :  { %3200 = vmatprep.subr.bf16.mxu1 %v4676_v1 }
 0x181   :  { %v446_v32 = vpop.f32.mrb[0].mxu1  ;;  %v741_v5 = vpop.f32.mrb[0].mxu0 }
 0x182   :  { %v3464_v6 = vadd.f32 %v2093_v28, %v446_v32  ;;  %v2506_v9 = vpop.f32.mrb[1].mxu1  ;;  %v2611_v50 = vpop.f32.mrb[1].mxu0  ;;  %v1417_v28 = vld [vmem:[#allocation8 + $0x30] sm:$0xff]  ;;  %v1418_v32 = vld [vmem:[#allocation8 + $0x38] sm:$0xff] }
 0x184   :  { %v3465_v43 = vadd.f32 %v3464_v6, %v741_v5  ;;  %v1419_v5 = vld [vmem:[#allocation8 + $0x40] sm:$0xff] }
 0x186   :  { %v745_v41 = vmax.f32 %v3465_v43, 0.0 }
 0x188   :  { %v4222_v22 = vand.u32 4294901760, %v745_v41 }
 0x18a   :  { %v4225_v35 = vsub.f32 %v745_v41, %v4222_v22  ;;  %v1416_v41 = vld [vmem:[#allocation8 + $0x28] sm:$0xff] }
 0x18c   :  { %v852_v46 = vand.u32 4294901760, %v4225_v35 }
 0x18e   :  { %v853_v30 = vsub.f32 %v4225_v35, %v852_v46 }
 0x190   :  { %v854_v17 = vand.u32 4294901760, %v853_v30  ;;  %v1414_v30 = vld [vmem:[#allocation8 + $0x18] sm:$0xff] }
 0x191   :  { %v1444_v43 = vand.u32 4294901760, %v1414_v30 }
 0x192   :  { %2645 = vmatmul.mubr.f32.vlgmr.msra.gmra.mrb[2].mxu1 %v854_v17 }
 0x193   :  { %3202 = vmatpush3.bf16.msra.mxu1 %v4145_v47  ;;  %2679 = vmatprep.mubr.msk.f32.mxu1 %vm3631_vm0, %v4671_v14  ;;  %v1411_v47 = vld [vmem:[#allocation8] sm:$0xff]  ;;  %v4257_v42 = vsub.f32 %v1414_v30, %v1444_v43 }
 0x194   :  { %3203 = vmatprep.subr.bf16.mxu1 %v4676_v1  ;;  %v1435_v17 = vand.u32 4294901760, %v1411_v47 }
 0x197   :  { %3205 = vmatpush3.bf16.msra.mxu1 %v4161_v33  ;;  %v1412_v33 = vld [vmem:[#allocation8 + $0x8] sm:$0xff] }
 0x198   :  { %3206 = vmatprep.subr.bf16.mxu1 %v4676_v1 }
 0x19b   :  { %3208 = vmatpush3.bf16.msra.mxu1 %v3207_v3  ;;  %v1413_v3 = vld [vmem:[#allocation8 + $0x10] sm:$0xff] }
 0x19c   :  { %3209 = vmatprep.subr.bf16.mxu1 %v4676_v1 }
 0x19f   :  { %3211 = vmatpush3.bf16.msra.mxu1 %v3210_v19  ;;  %v1438_v19 = vand.u32 4294901760, %v1412_v33 }
 0x1a0   :  { %3212 = vmatprep.subr.bf16.mxu1 %v4676_v1 }
 0x1a1   :  { %v4247_v6 = vpack.c.bf16 %v1438_v19, %v1435_v17  ;;  %v4251_v9 = vsub.f32 %v1412_v33, %v1438_v19  ;;  %v1456_v33 = vand.u32 4294901760, %v1418_v32 }
 0x1a3   :  { %3214 = vmatpush3.bf16.msra.mxu1 %v3213_v21  ;;  %v1441_v21 = vand.u32 4294901760, %v1413_v3  ;;  %3322 = vmatpush3.bf16.msra.mxu0 %v4247_v6  ;;  %v4271_v30 = vsub.f32 %v1418_v32, %v1456_v33 }
 0x1a4   :  { %3215 = vmatprep.subr.bf16.mxu1 %v4676_v1  ;;  %3323 = vmatprep.subr.bf16.mxu0 %v4676_v1 }
 0x1a5   :  { %v4253_v50 = vsub.f32 %v1413_v3, %v1441_v21  ;;  %v4255_v63 = vpack.c.bf16 %v1444_v43, %v1441_v21  ;;  %v1462_v3 = vand.u32 4294901760, %v1420_v10 }
 0x1a7   :  { %3217 = vmatpush3.bf16.msra.mxu1 %v3216_v27  ;;  %v1415_v27 = vld [vmem:[#allocation8 + $0x20] sm:$0xff]  ;;  %3325 = vmatpush3.bf16.msra.mxu0 %v4255_v63 }
 0x1a8   :  { %3218 = vmatprep.subr.bf16.mxu1 %v4676_v1  ;;  %3326 = vmatprep.subr.bf16.mxu0 %v4676_v1 }
 0x1ab   :  { %3220 = vmatpush3.bf16.msra.mxu1 %v3219_v4  ;;  %v1447_v4 = vand.u32 4294901760, %v1415_v27 }
 0x1ac   :  { %3221 = vmatprep.subr.bf16.mxu1 %v4676_v1 }
 0x1ad   :  { %v4259_v13 = vsub.f32 %v1415_v27, %v1447_v4  ;;  %v4275_v27 = vsub.f32 %v1420_v10, %v1462_v3 }
 0x1af   :  { %3223 = vmatpush3.bf16.msra.mxu1 %v3222_v51  ;;  %v1450_v51 = vand.u32 4294901760, %v1416_v41 }
 0x1b0   :  { %3224 = vmatprep.subr.bf16.mxu1 %v4676_v1 }
 0x1b1   :  { %v4265_v12 = vsub.f32 %v1416_v41, %v1450_v51 }
 0x1b2   :  { %2680 = vmatmul.mubr.f32.vlgmr.msra.gmra.mrb[2].mxu1 %v4222_v22 }
 0x1b3   :  { %3226 = vmatpush3.bf16.msra.mxu1 %v3225_v55  ;;  %2714 = vmatprep.mubr.msk.f32.mxu1 %vm3631_vm0, %v4671_v14  ;;  %v4249_v55 = vsub.f32 %v1411_v47, %v1435_v17  ;;  %v1453_v47 = vand.u32 4294901760, %v1417_v28  ;;  %v1459_v17 = vand.u32 4294901760, %v1419_v5 }
 0x1b4   :  { %3227 = vmatprep.subr.bf16.mxu1 %v4676_v1 }
 0x1b5   :  { %v4269_v19 = vsub.f32 %v1417_v28, %v1453_v47  ;;  %v4273_v21 = vsub.f32 %v1419_v5, %v1459_v17  ;;  %v4289_v10 = vpack.c.bf16 %v1456_v33, %v1453_v47 }
 0x1b7   :  { %3229 = vmatpush3.bf16.msra.mxu1 %v3228_v11  ;;  %v4281_v11 = vpack.c.bf16 %v1450_v51, %v1447_v4 }
 0x1b8   :  { %3230 = vmatprep.subr.bf16.mxu1 %v4676_v1 }
 0x1b9   :  { %3328 = vmatpush3.bf16.msra.mxu0 %v4281_v11 }
 0x1ba   :  { %3329 = vmatprep.subr.bf16.mxu0 %v4676_v1 }
 0x1bb   :  { %3232 = vmatpush3.bf16.msra.mxu1 %v3231_v16  ;;  %v4297_v16 = vpack.c.bf16 %v1462_v3, %v1459_v17 }
 0x1bc   :  { %3233 = vmatprep.subr.bf16.mxu1 %v4676_v1 }
 0x1bd   :  { %3331 = vmatpush3.bf16.msra.mxu0 %v4289_v10 }
 0x1be   :  { %3332 = vmatprep.subr.bf16.mxu0 %v4676_v1 }
 0x1bf   :  { %3235 = vmatpush3.bf16.msra.mxu1 %v3234_v62  ;;  %v3273_v62 = vpack.c.bf16 %v870_v20, %v863_v26  ;;  %v3279_v26 = vpack.c.bf16 %v4688_v59, %v4687_v39  ;;  %v4689_v20 = vand.u32 4294901760, %v4685_v31  ;;  %v4695_v31 = vand.u32 4294901760, %v4134_v48 }
 0x1c0   :  { %3236 = vmatprep.subr.bf16.mxu1 %v4676_v1  ;;  %v1474_v48 = vand.u32 4294901760, %v1424_v52 }
 0x1c1   :  { %3334 = vmatpush3.bf16.msra.mxu0 %v4297_v16  ;;  %v3282_v8 = vpack.c.bf16 %v4690_v54, %v4689_v20  ;;  %v1556_v20 = vand.u32 4294901760, %v4259_v13  ;;  %v1563_v54 = vand.u32 4294901760, %v4265_v12 }
 0x1c2   :  { %3335 = vmatprep.subr.bf16.mxu0 %v4676_v1  ;;  %v4421_v5 = vsub.f32 %v1424_v52, %v1474_v48 }
 0x1c3   :  { %3238 = vmatpush3.bf16.msra.mxu1 %v3237_v37  ;;  %v3276_v37 = vpack.c.bf16 %v884_v44, %v877_v24  ;;  %v4691_v24 = vand.u32 4294901760, %v4125_v38  ;;  %v4692_v44 = vand.u32 4294901760, %v4127_v15  ;;  %v4697_v38 = vand.u32 4294901760, %v4138_v0 }
 0x1c4   :  { %3239 = vmatprep.subr.bf16.mxu1 %v4676_v1  ;;  %v4698_v15 = vand.u32 4294901760, %v4140_v61  ;;  %v1477_v0 = vand.u32 4294901760, %v1425_v34 }
 0x1c6   :  { %v4424_v47 = vsub.f32 %v1425_v34, %v1477_v0 }
 0x1c7   :  { %3241 = vmatpush3.bf16.msra.mxu1 %v3240_v60  ;;  %v3291_v60 = vpack.c.bf16 %v4696_v58, %v4695_v31  ;;  %v1570_v31 = vand.u32 4294901760, %v4269_v19  ;;  %v1577_v58 = vand.u32 4294901760, %v4271_v30 }
 0x1c8   :  { %3242 = vmatprep.subr.bf16.mxu1 %v4676_v1 }
 0x1cb   :  { %3244 = vmatpush3.bf16.msra.mxu1 %v3243_v18  ;;  %v3294_v18 = vpack.c.bf16 %v4698_v15, %v4697_v38  ;;  %v1571_v38 = vsub.f32 %v4269_v19, %v1570_v31  ;;  %v1578_v15 = vsub.f32 %v4271_v30, %v1577_v58 }
 0x1cc   :  { %3245 = vmatprep.subr.bf16.mxu1 %v4676_v1 }
 0x1cf   :  { %3247 = vmatpush3.bf16.msra.mxu1 %v3246_v23  ;;  %v1535_v23 = vand.u32 4294901760, %v4251_v9 }
 0x1d0   :  { %3248 = vmatprep.subr.bf16.mxu1 %v4676_v1 }
 0x1d1   :  { %v1536_v4 = vsub.f32 %v4251_v9, %v1535_v23 }
 0x1d2   :  { %2715 = vmatmul.mubr.f32.vlgmr.msra.gmra.mrb[2].mxu1 %v4225_v35  ;;  %v3288_v35 = vpack.c.bf16 %v4694_v40, %v4693_v53 }
 0x1d3   :  { %3250 = vmatpush3.bf16.msra.mxu1 %v4067_v36  ;;  %2749 = vmatprep.mubr.msk.f32.mxu1 %vm3631_vm0, %v4671_v14  ;;  %v1537_v3 = vand.u32 4294901760, %v1536_v4 }
 0x1d4   :  { %3251 = vmatprep.subr.bf16.mxu1 %v4676_v1 }
 0x1d7   :  { %3253 = vmatpush3.bf16.msra.mxu1 %v4078_v49 }
 0x1d8   :  { %3254 = vmatprep.subr.bf16.mxu1 %v4676_v1 }
 0x1db   :  { %3256 = vmatpush3.bf16.msra.mxu1 %v4090_v56 }
 0x1dc   :  { %3257 = vmatprep.subr.bf16.mxu1 %v4676_v1 }
 0x1df   :  { %3259 = vmatpush3.bf16.msra.mxu1 %v4098_v2 }
 0x1e0   :  { %3260 = vmatprep.subr.bf16.mxu1 %v4676_v1 }
 0x1e3   :  { %3262 = vmatpush3.bf16.msra.mxu1 %v4103_v7 }
 0x1e4   :  { %3263 = vmatprep.subr.bf16.mxu1 %v4676_v1 }
 0x1e7   :  { %3265 = vmatpush3.bf16.msra.mxu1 %v4107_v25 }
 0x1e8   :  { %3266 = vmatprep.subr.bf16.mxu1 %v4676_v1 }
 0x1eb   :  { %3268 = vmatpush3.bf16.msra.mxu1 %v4111_v45 }
 0x1ec   :  { %3269 = vmatprep.subr.bf16.mxu1 %v4676_v1 }
 0x1ef   :  { %3271 = vmatpush3.bf16.msra.mxu1 %v4117_v57 }
 0x1f0   :  { %3272 = vmatprep.subr.bf16.mxu1 %v4676_v1 }
 0x1f2   :  { %2750 = vmatmul.mubr.f32.vlgmr.msra.gmra.mrb[2].mxu1 %v852_v46  ;;  %v3285_v46 = vpack.c.bf16 %v4692_v44, %v4691_v24  ;;  %v1557_v44 = vsub.f32 %v4259_v13, %v1556_v20 }
 0x1f3   :  { %3274 = vmatpush3.bf16.msra.mxu1 %v3273_v62  ;;  %2784 = vmatprep.mubr.msk.f32.mxu1 %vm3631_vm0, %v4671_v14  ;;  %v1542_v62 = vand.u32 4294901760, %v4253_v50 }
 0x1f4   :  { %3275 = vmatprep.subr.bf16.mxu1 %v4676_v1  ;;  %v1558_v40 = vand.u32 4294901760, %v1557_v44 }
 0x1f5   :  { %v1543_v59 = vsub.f32 %v4253_v50, %v1542_v62 }
 0x1f7   :  { %3277 = vmatpush3.bf16.msra.mxu1 %v3276_v37  ;;  %v1549_v37 = vand.u32 4294901760, %v4257_v42 }
 0x1f8   :  { %3278 = vmatprep.subr.bf16.mxu1 %v4676_v1 }
 0x1fb   :  { %3280 = vmatpush3.bf16.msra.mxu1 %v3279_v26  ;;  %v1550_v26 = vsub.f32 %v4257_v42, %v1549_v37 }
 0x1fc   :  { %3281 = vmatprep.subr.bf16.mxu1 %v4676_v1 }
 0x1fd   :  { %v1551_v24 = vand.u32 4294901760, %v1550_v26 }
 0x1ff   :  { %3283 = vmatpush3.bf16.msra.mxu1 %v3282_v8  ;;  %v1544_v8 = vand.u32 4294901760, %v1543_v59  ;;  %v4666_v59 = vand.u32 4294901760, %v4421_v5 }
 0x200   :  { %3284 = vmatprep.subr.bf16.mxu1 %v4676_v1 }
 0x201   :  { %v3348_v53 = vpack.c.bf16 %v1551_v24, %v1544_v8  ;;  %v1620_v24 = vsub.f32 %v4421_v5, %v4666_v59 }
 0x203   :  { %3286 = vmatpush3.bf16.msra.mxu1 %v3285_v46  ;;  %v1564_v46 = vsub.f32 %v4265_v12, %v1563_v54 }
 0x204   :  { %3287 = vmatprep.subr.bf16.mxu1 %v4676_v1 }
 0x207   :  { %3289 = vmatpush3.bf16.msra.mxu1 %v3288_v35  ;;  %v1565_v35 = vand.u32 4294901760, %v1564_v46  ;;  %v1621_v46 = vand.u32 4294901760, %v1620_v24 }
 0x208   :  { %3290 = vmatprep.subr.bf16.mxu1 %v4676_v1 }
 0x20b   :  { %3292 = vmatpush3.bf16.msra.mxu1 %v3291_v60  ;;  %v3351_v60 = vpack.c.bf16 %v1565_v35, %v1558_v40  ;;  %v4665_v40 = vand.u32 4294901760, %v4424_v47 }
 0x20c   :  { %3293 = vmatprep.subr.bf16.mxu1 %v4676_v1 }
 0x20f   :  { %3295 = vmatpush3.bf16.msra.mxu1 %v3294_v18  ;;  %v1572_v18 = vand.u32 4294901760, %v1571_v38 }
 0x210   :  { %3296 = vmatprep.subr.bf16.mxu1 %v4676_v1 }
 0x212   :  { %2785 = vmatmul.mubr.f32.vlgmr.msra.gmra.mrb[2].mxu1 %v4222_v22 }
 0x213   :  { %3298 = vmatpush3.bf16.msra.mxu1 %v4067_v36  ;;  %2819 = vmatprep.mubr.msk.f32.mxu1 %vm3631_vm0, %v4671_v14  ;;  %v1421_v36 = vld [vmem:[#allocation8 + $0x50] sm:$0xff] }
 0x214   :  { %3299 = vmatprep.subr.bf16.mxu1 %v4676_v1 }
 0x217   :  { %3301 = vmatpush3.bf16.msra.mxu1 %v4078_v49  ;;  %v1422_v49 = vld [vmem:[#allocation8 + $0x58] sm:$0xff] }
 0x218   :  { %3302 = vmatprep.subr.bf16.mxu1 %v4676_v1 }
 0x21b   :  { %3304 = vmatpush3.bf16.msra.mxu1 %v4090_v56  ;;  %v1465_v56 = vand.u32 4294901760, %v1421_v36 }
 0x21c   :  { %3305 = vmatprep.subr.bf16.mxu1 %v4676_v1 }
 0x21d   :  { %v4415_v51 = vsub.f32 %v1421_v36, %v1465_v56  ;;  %v1579_v36 = vand.u32 4294901760, %v1578_v15  ;;  %v1627_v15 = vsub.f32 %v4424_v47, %v4665_v40 }
 0x21f   :  { %3307 = vmatpush3.bf16.msra.mxu1 %v4098_v2  ;;  %v1468_v2 = vand.u32 4294901760, %v1422_v49  ;;  %v1598_v34 = vand.u32 4294901760, %v4415_v51 }
 0x220   :  { %3308 = vmatprep.subr.bf16.mxu1 %v4676_v1 }
 0x221   :  { %v4397_v29 = vpack.c.bf16 %v1468_v2, %v1465_v56  ;;  %v4417_v28 = vsub.f32 %v1422_v49, %v1468_v2  ;;  %v1584_v49 = vand.u32 4294901760, %v4273_v21  ;;  %v1591_v56 = vand.u32 4294901760, %v4275_v27 }
 0x222   :  { %v3354_v2 = vpack.c.bf16 %v1579_v36, %v1572_v18  ;;  %v1628_v36 = vand.u32 4294901760, %v1627_v15 }
 0x223   :  { %3310 = vmatpush3.bf16.msra.mxu1 %v4103_v7  ;;  %v1423_v7 = vld [vmem:[#allocation8 + $0x60] sm:$0xff]  ;;  %3337 = vmatpush3.bf16.msra.mxu0 %v4397_v29  ;;  %v1592_v52 = vsub.f32 %v4275_v27, %v1591_v56 }
 0x224   :  { %3311 = vmatprep.subr.bf16.mxu1 %v4676_v1  ;;  %3338 = vmatprep.subr.bf16.mxu0 %v4676_v1 }
 0x227   :  { %3313 = vmatpush3.bf16.msra.mxu1 %v4107_v25  ;;  %v1471_v25 = vand.u32 4294901760, %v1423_v7 }
 0x228   :  { %3314 = vmatprep.subr.bf16.mxu1 %v4676_v1 }
 0x229   :  { %v4419_v32 = vsub.f32 %v1423_v7, %v1471_v25  ;;  %v1585_v7 = vsub.f32 %v4273_v21, %v1584_v49 }
 0x22b   :  { %3316 = vmatpush3.bf16.msra.mxu1 %v4111_v45  ;;  %v4401_v45 = vpack.c.bf16 %v1474_v48, %v1471_v25  ;;  %v1586_v25 = vand.u32 4294901760, %v1585_v7  ;;  %v1593_v48 = vand.u32 4294901760, %v1592_v52 }
 0x22c   :  { %3317 = vmatprep.subr.bf16.mxu1 %v4676_v1 }
 0x22d   :  { %3340 = vmatpush3.bf16.msra.mxu0 %v4401_v45 }
 0x22e   :  { %3341 = vmatprep.subr.bf16.mxu0 %v4676_v1 }
 0x22f   :  { %3319 = vmatpush3.bf16.msra.mxu1 %v4117_v57  ;;  %v1426_v57 = vld [vmem:[#allocation8 + $0x78] sm:$0xff] }
 0x230   :  { %v1480_v61 = vand.u32 4294901760, %v1426_v57 }
 0x232   :  { %2820 = vmatmul.mubr.f32.vlgmr.msra.gmra.mrb[2].mxu1 %v4222_v22  ;;  %v1528_v22 = vand.u32 4294901760, %v4249_v55  ;;  %v4407_v41 = vpack.c.bf16 %v1480_v61, %v1477_v0  ;;  %v4426_v33 = vsub.f32 %v1426_v57, %v1480_v61  ;;  %v1605_v57 = vand.u32 4294901760, %v4417_v28 }
 0x233   :  { %v3357_v0 = vpack.c.bf16 %v1593_v48, %v1586_v25  ;;  %v1599_v61 = vsub.f32 %v4415_v51, %v1598_v34  ;;  %v3369_v25 = vpack.c.bf16 %v4251_v9, %v4249_v55  ;;  %v3372_v48 = vpack.c.bf16 %v4257_v42, %v4253_v50 }
 0x234   :  { %v1529_v43 = vsub.f32 %v4249_v55, %v1528_v22  ;;  %3343 = vmatpush3.bf16.msra.mxu0 %v4407_v41  ;;  %v4664_v35 = vand.u32 4294901760, %v4426_v33  ;;  %v3390_v24 = vpack.c.bf16 %v4426_v33, %v4424_v47  ;;  %v3423_v55 = vpack.c.bf16 %v1563_v54, %v1556_v20 }
 0x235   :  { %3344 = vmatprep.subr.bf16.mxu0 %v4676_v1  ;;  %v1600_v4 = vand.u32 4294901760, %v1599_v61  ;;  %v3375_v61 = vpack.c.bf16 %v4265_v12, %v4259_v13  ;;  %v3426_v42 = vpack.c.bf16 %v1577_v58, %v1570_v31  ;;  %v3429_v9 = vpack.c.bf16 %v1591_v56, %v1584_v49 }
 0x236   :  { %v1530_v17 = vand.u32 4294901760, %v1529_v43  ;;  %v1606_v43 = vsub.f32 %v4417_v28, %v1605_v57  ;;  %v1634_v18 = vsub.f32 %v4426_v33, %v4664_v35  ;;  %v3432_v12 = vpack.c.bf16 %v1605_v57, %v1598_v34 }
 0x237   :  { %v4699_v13 = vand.u32 4294901760, %v4419_v32  ;;  %v4700_v50 = vand.u32 4294901760, %v4421_v5 }
 0x238   :  { %v4431_v39 = vpack.c.bf16 %v1537_v3, %v1530_v17  ;;  %v1607_v17 = vand.u32 4294901760, %v1606_v43  ;;  %v4667_v3 = vand.u32 4294901760, %v4419_v32  ;;  %v1635_v7 = vand.u32 4294901760, %v1634_v18 }
 0x239   :  { %v3378_v43 = vpack.c.bf16 %v4271_v30, %v4269_v19  ;;  %v3435_v19 = vpack.c.bf16 %v4700_v50, %v4699_v13  ;;  %v4701_v30 = vand.u32 4294901760, %v4424_v47 }
 0x23a   :  { %v3360_v26 = vpack.c.bf16 %v1607_v17, %v1600_v4  ;;  %v1613_v8 = vsub.f32 %v4419_v32, %v4667_v3  ;;  %v3366_v52 = vpack.c.bf16 %v1635_v7, %v1628_v36  ;;  %v3381_v4 = vpack.c.bf16 %v4275_v27, %v4273_v21 }
 0x23b   :  { %v3384_v17 = vpack.c.bf16 %v4417_v28, %v4415_v51  ;;  %v4702_v21 = vand.u32 4294901760, %v4426_v33 }
 0x23c   :  { %v1614_v44 = vand.u32 4294901760, %v1613_v8  ;;  %v3387_v8 = vpack.c.bf16 %v4421_v5, %v4419_v32 }
 0x23d   :  { %v3438_v27 = vpack.c.bf16 %v4702_v21, %v4701_v30 }
 0x23e   :  { %v3363_v38 = vpack.c.bf16 %v1621_v46, %v1614_v44  ;;  %v2094_v44 = vld [vmem:[%s4630_s5] ss:$0 sm:$0xff] }
 0x305   :  { %v1406_v46 = vpop.f32.mrb[2].mxu1 }
 0x306   :  { %v3466_v15 = vadd.f32 %v2094_v44, %v1406_v46  ;;  %v2821_v18 = vpop.f32.mrb[3].mxu1 }
 0x308   :  { %v1410_v36 = vmax.f32 %v3466_v15, 0.0 }
 0x30a   :  { %v4506_v7 = vand.u32 4294901760, %v1410_v36 }
 0x30c   :  { %v1516_v35 = vsub.f32 %v1410_v36, %v4506_v7 }
 0x30e   :  { %v1517_v40 = vand.u32 4294901760, %v1516_v35 }
 0x310   :  { %v1518_v59 = vsub.f32 %v1516_v35, %v1517_v40 }
 0x312   :  { %v1519_v3 = vand.u32 4294901760, %v1518_v59 }
 0x314   :  { %2855 = vmatmul.mubr.f32.vlgmr.msra.gmra.mrb[2].mxu0 %v1519_v3 }
 0x315   :  { %3346 = vmatpush3.bf16.msra.mxu0 %v4431_v39  ;;  %2889 = vmatprep.mubr.msk.f32.mxu0 %vm3631_vm0, %v4671_v14  ;;  %v3417_v39 = vpack.c.bf16 %v1535_v23, %v1528_v22 }
 0x316   :  { %3347 = vmatprep.subr.bf16.mxu0 %v4676_v1 }
 0x319   :  { %3349 = vmatpush3.bf16.msra.mxu0 %v3348_v53  ;;  %v3420_v53 = vpack.c.bf16 %v1549_v37, %v1542_v62 }
 0x31a   :  { %3350 = vmatprep.subr.bf16.mxu0 %v4676_v1 }
 0x31d   :  { %3352 = vmatpush3.bf16.msra.mxu0 %v3351_v60 }
 0x31e   :  { %3353 = vmatprep.subr.bf16.mxu0 %v4676_v1 }
 0x321   :  { %3355 = vmatpush3.bf16.msra.mxu0 %v3354_v2 }
 0x322   :  { %3356 = vmatprep.subr.bf16.mxu0 %v4676_v1 }
 0x325   :  { %3358 = vmatpush3.bf16.msra.mxu0 %v3357_v0 }
 0x326   :  { %3359 = vmatprep.subr.bf16.mxu0 %v4676_v1 }
 0x329   :  { %3361 = vmatpush3.bf16.msra.mxu0 %v3360_v26 }
 0x32a   :  { %3362 = vmatprep.subr.bf16.mxu0 %v4676_v1 }
 0x32d   :  { %3364 = vmatpush3.bf16.msra.mxu0 %v3363_v38 }
 0x32e   :  { %3365 = vmatprep.subr.bf16.mxu0 %v4676_v1 }
 0x331   :  { %3367 = vmatpush3.bf16.msra.mxu0 %v3366_v52 }
 0x332   :  { %3368 = vmatprep.subr.bf16.mxu0 %v4676_v1 }
 0x334   :  { %2890 = vmatmul.mubr.f32.vlgmr.msra.gmra.mrb[2].mxu0 %v4506_v7 }
 0x335   :  { %3370 = vmatpush3.bf16.msra.mxu0 %v3369_v25  ;;  %2924 = vmatprep.mubr.msk.f32.mxu0 %vm3631_vm0, %v4671_v14 }
 0x336   :  { %3371 = vmatprep.subr.bf16.mxu0 %v4676_v1 }
 0x339   :  { %3373 = vmatpush3.bf16.msra.mxu0 %v3372_v48 }
 0x33a   :  { %3374 = vmatprep.subr.bf16.mxu0 %v4676_v1 }
 0x33d   :  { %3376 = vmatpush3.bf16.msra.mxu0 %v3375_v61 }
 0x33e   :  { %3377 = vmatprep.subr.bf16.mxu0 %v4676_v1 }
 0x341   :  { %3379 = vmatpush3.bf16.msra.mxu0 %v3378_v43 }
 0x342   :  { %3380 = vmatprep.subr.bf16.mxu0 %v4676_v1 }
 0x345   :  { %3382 = vmatpush3.bf16.msra.mxu0 %v3381_v4 }
 0x346   :  { %3383 = vmatprep.subr.bf16.mxu0 %v4676_v1 }
 0x349   :  { %3385 = vmatpush3.bf16.msra.mxu0 %v3384_v17 }
 0x34a   :  { %3386 = vmatprep.subr.bf16.mxu0 %v4676_v1 }
 0x34d   :  { %3388 = vmatpush3.bf16.msra.mxu0 %v3387_v8 }
 0x34e   :  { %3389 = vmatprep.subr.bf16.mxu0 %v4676_v1 }
 0x351   :  { %3391 = vmatpush3.bf16.msra.mxu0 %v3390_v24 }
 0x352   :  { %3392 = vmatprep.subr.bf16.mxu0 %v4676_v1 }
 0x354   :  { %2925 = vmatmul.mubr.f32.vlgmr.msra.gmra.mrb[2].mxu0 %v1516_v35 }
 0x355   :  { %3394 = vmatpush3.bf16.msra.mxu0 %v4247_v6  ;;  %2959 = vmatprep.mubr.msk.f32.mxu0 %vm3631_vm0, %v4671_v14 }
 0x356   :  { %3395 = vmatprep.subr.bf16.mxu0 %v4676_v1 }
 0x359   :  { %3397 = vmatpush3.bf16.msra.mxu0 %v4255_v63 }
 0x35a   :  { %3398 = vmatprep.subr.bf16.mxu0 %v4676_v1 }
 0x35d   :  { %3400 = vmatpush3.bf16.msra.mxu0 %v4281_v11 }
 0x35e   :  { %3401 = vmatprep.subr.bf16.mxu0 %v4676_v1 }
 0x361   :  { %3403 = vmatpush3.bf16.msra.mxu0 %v4289_v10 }
 0x362   :  { %3404 = vmatprep.subr.bf16.mxu0 %v4676_v1 }
 0x365   :  { %3406 = vmatpush3.bf16.msra.mxu0 %v4297_v16 }
 0x366   :  { %3407 = vmatprep.subr.bf16.mxu0 %v4676_v1 }
 0x369   :  { %3409 = vmatpush3.bf16.msra.mxu0 %v4397_v29 }
 0x36a   :  { %3410 = vmatprep.subr.bf16.mxu0 %v4676_v1 }
 0x36d   :  { %3412 = vmatpush3.bf16.msra.mxu0 %v4401_v45 }
 0x36e   :  { %3413 = vmatprep.subr.bf16.mxu0 %v4676_v1 }
 0x371   :  { %3415 = vmatpush3.bf16.msra.mxu0 %v4407_v41 }
 0x372   :  { %3416 = vmatprep.subr.bf16.mxu0 %v4676_v1 }
 0x374   :  { %2960 = vmatmul.mubr.f32.vlgmr.msra.gmra.mrb[2].mxu0 %v1517_v40 }
 0x375   :  { %3418 = vmatpush3.bf16.msra.mxu0 %v3417_v39  ;;  %2994 = vmatprep.mubr.msk.f32.mxu0 %vm3631_vm0, %v4671_v14 }
 0x376   :  { %3419 = vmatprep.subr.bf16.mxu0 %v4676_v1 }
 0x379   :  { %3421 = vmatpush3.bf16.msra.mxu0 %v3420_v53 }
 0x37a   :  { %3422 = vmatprep.subr.bf16.mxu0 %v4676_v1 }
 0x37d   :  { %3424 = vmatpush3.bf16.msra.mxu0 %v3423_v55 }
 0x37e   :  { %3425 = vmatprep.subr.bf16.mxu0 %v4676_v1 }
 0x381   :  { %3427 = vmatpush3.bf16.msra.mxu0 %v3426_v42 }
 0x382   :  { %3428 = vmatprep.subr.bf16.mxu0 %v4676_v1 }
 0x385   :  { %3430 = vmatpush3.bf16.msra.mxu0 %v3429_v9 }
 0x386   :  { %3431 = vmatprep.subr.bf16.mxu0 %v4676_v1 }
 0x389   :  { %3433 = vmatpush3.bf16.msra.mxu0 %v3432_v12 }
 0x38a   :  { %3434 = vmatprep.subr.bf16.mxu0 %v4676_v1 }
 0x38d   :  { %3436 = vmatpush3.bf16.msra.mxu0 %v3435_v19 }
 0x38e   :  { %3437 = vmatprep.subr.bf16.mxu0 %v4676_v1 }
 0x391   :  { %3439 = vmatpush3.bf16.msra.mxu0 %v3438_v27 }
 0x392   :  { %3440 = vmatprep.subr.bf16.mxu0 %v4676_v1 }
 0x394   :  { %2995 = vmatmul.mubr.f32.vlgmr.msra.gmra.mrb[2].mxu0 %v4506_v7 }
 0x395   :  { %3442 = vmatpush3.bf16.msra.mxu0 %v4247_v6  ;;  %3029 = vmatprep.mubr.msk.f32.mxu0 %vm3631_vm0, %v4671_v14  ;;  %v2095_v14 = vld [vmem:[%s4631_s6] ss:$0 sm:$0xff] }
 0x396   :  { %3443 = vmatprep.subr.bf16.mxu0 %v4676_v1 }
 0x399   :  { %3445 = vmatpush3.bf16.msra.mxu0 %v4255_v63 }
 0x39a   :  { %3446 = vmatprep.subr.bf16.mxu0 %v4676_v1 }
 0x39d   :  { %3448 = vmatpush3.bf16.msra.mxu0 %v4281_v11 }
 0x39e   :  { %3449 = vmatprep.subr.bf16.mxu0 %v4676_v1 }
 0x3a1   :  { %3451 = vmatpush3.bf16.msra.mxu0 %v4289_v10 }
 0x3a2   :  { %3452 = vmatprep.subr.bf16.mxu0 %v4676_v1 }
 0x3a5   :  { %3454 = vmatpush3.bf16.msra.mxu0 %v4297_v16 }
 0x3a6   :  { %3455 = vmatprep.subr.bf16.mxu0 %v4676_v1 }
 0x3a9   :  { %3457 = vmatpush3.bf16.msra.mxu0 %v4397_v29 }
 0x3aa   :  { %3458 = vmatprep.subr.bf16.mxu0 %v4676_v1 }
 0x3ad   :  { %3460 = vmatpush3.bf16.msra.mxu0 %v4401_v45 }
 0x3ae   :  { %3461 = vmatprep.subr.bf16.mxu0 %v4676_v1 }
 0x3b1   :  { %3463 = vmatpush3.bf16.msra.mxu0 %v4407_v41 }
 0x3b4   :  { %3030 = vmatmul.mubr.f32.vlgmr.msra.gmra.mrb[2].mxu0 %v4506_v7 }
 0x487   :  { %v2071_v63 = vpop.f32.mrb[2].mxu0 }
 0x488   :  { %v3467_v6 = vadd.f32 %v2095_v14, %v2071_v63  ;;  %v3031_v11 = vpop.f32.mrb[3].mxu0 }
 0x48a   :  { %2075 = vst [vmem:[#allocation10] sm:$0xf] %v3467_v6 }
 0x48b   :  { %3605 = shalt.err (!%p3602_p8)
}
 0x48c   :  { %s3606_s9 = scalar_lea.hbm %s4632_s7, 64 }
 0x48d   :  { %p3607_p9 = scmp.ne.s32.totalorder %s4632_s7, %s3606_s9  ;;  %p3610_p10 = scmp.lt.u32.totalorder %s3606_s9, %s4632_s7 }
 0x48f   :  { %p3612_p11 = pnand %p3610_p10, %p3607_p9 }
 0x491   :  { %3615 = shalt.err (!%p3612_p11)
}
 0x492   :  { %2085 = dma.vmem_to_hbm [thread:$0]  %s2083_s28, 64, %s4632_s7, [#allocation4]  }
 0x493   :  { %3622 = dma.done.wait [#allocation4], 64  }
 0x494   :  { %3623 = vsyncadd [#allocation4], 4294967232 }
 0x495   :  { %2089 = vsyncpa [#allocation3], 1 }
 0x496   :  { %2090 = vsyncpa [#allocation6], 1 }
 0x497   :  { %2091 = vsyncpa [#allocation9], 1 }
 0x498   :  { %2092 = vsyncpa [#allocation4], 1 }

</bundles_post_ra>
